<compile_context>
chip_gen: v5e
topology: v5e:2x2
jax: 0.10.0
libtpu: 0.0.40
codegen_flags: <defaults>
</compile_context>

<pallas_src>
import numpy as np

import jax
import jax.numpy as jnp
from jax.experimental import pallas as pl
from jax.experimental.pallas import tpu as pltpu

# ----------------------------------------------------------------------------
# Synthetic ENCODER_* configuration (the reference file imports these globals).
# ----------------------------------------------------------------------------
XQUANTIZE = 16
YQUANTIZE = 16
ENCODER_LAYER_DESCRIPTION = ["conv", "pool", "conv", "pool", "linear", "linear_last"]
ENCODER_FILTER_NUM = [4, 8, 16]          # [Cin, C1, C2]
ENCODER_KERNEL_SIZE = [3, 3]
ENCODER_STRIDES = [1, 1]
ENCODER_PADDING = [1, 1]
ENCODER_MAX_POOL_SIZE = [2, 2]
ENCODER_FC_LAYERS = [32, 16]             # last layer = 2 * latent_dim (mu, logvar)


def compute_dim_sizes():
    x_dim, y_dim = XQUANTIZE, YQUANTIZE
    conv_idx = maxpool_idx = 0
    for action in ENCODER_LAYER_DESCRIPTION:
        if "conv" in action:
            k, s, p = (ENCODER_KERNEL_SIZE[conv_idx], ENCODER_STRIDES[conv_idx],
                       ENCODER_PADDING[conv_idx])
            x_dim = int((x_dim - (k - s) + 2 * p) / s)
            y_dim = int((y_dim - (k - s) + 2 * p) / s)
            conv_idx += 1
        elif "pool" in action:
            x_dim = int(x_dim / ENCODER_MAX_POOL_SIZE[maxpool_idx])
            y_dim = int(y_dim / ENCODER_MAX_POOL_SIZE[maxpool_idx])
            maxpool_idx += 1
    return x_dim, y_dim


# ----------------------------------------------------------------------------
# The fused Pallas kernel (all intermediates stay in vregs/VMEM)
# ----------------------------------------------------------------------------
def _encoder_vae_fused_kernel(x0_ref, t0_ref, b0_ref,
                              wp0_ref, hp0_ref, dsh_ref,
                              t1_ref, b1_ref, wp1_ref,
                              fe_ref, fo_ref, g0_ref, bf0_ref,
                              wf1_ref, bf1_ref, o_ref):
    f32 = jnp.float32

    def dot(a, b):
        return jnp.dot(a, b, preferred_element_type=f32)

    # ---- conv0 + bias + ReLU: taps pre-fused along K -> ONE MXU matmul ----
    # x0: (N*H0, 3*W0*Cin), t0cat: (3*W0*Cin, W0*C1)
    a0 = jnp.maximum(dot(x0_ref[...], t0_ref[...]) + b0_ref[...], 0.0)

    # ---- 2x2 max-pool #0: W-pairs (right selection), H-pairs (left selection)
    yw0 = jnp.maximum(dot(a0, wp0_ref[0]), dot(a0, wp0_ref[1]))      # (N*H0, W1*C1)
    p1 = jnp.maximum(dot(hp0_ref[0], yw0), dot(hp0_ref[1], yw0))     # (N*H1, W1*C1)

    # ---- conv1 + bias + ReLU: 3-tap accumulate; +-1 H-shifts via 0/1 matmuls
    acc1 = dot(p1, t1_ref[1])                                        # dy = 1 (center)
    acc1 = acc1 + dot(dot(dsh_ref[0], p1), t1_ref[0])                # dy = 0 (row h-1)
    acc1 = acc1 + dot(dot(dsh_ref[1], p1), t1_ref[2])                # dy = 2 (row h+1)
    a1 = jnp.maximum(acc1 + b1_ref[...], 0.0)                        # (N*H1, W1*C2)

    # ---- 2x2 max-pool #1 (W-pairs), then fused H-pool + NCHW flatten + fc0 --
    yw1 = jnp.maximum(dot(a1, wp1_ref[0]), dot(a1, wp1_ref[1]))      # (N*H1, W2*C2)
    h2_sp = g0_ref.shape[0]
    hid = None
    for hh in range(h2_sp):
        row = jnp.maximum(dot(fe_ref[hh], yw1), dot(fo_ref[hh], yw1))  # (N, W2*C2)
        contrib = dot(row, g0_ref[hh])                                 # (N, F0)
        hid = contrib if hid is None else hid + contrib
    hid = jnp.maximum(hid + bf0_ref[...], 0.0)                       # fc0 + ReLU

    # ---- fc1 (no activation) ----
    o_ref[...] = (dot(hid, wf1_ref[...]) + bf1_ref[...]).astype(o_ref.dtype)


# ----------------------------------------------------------------------------
# One-time host-side weight repacking (folds conv lowering, W-padding and the
# PyTorch NCHW flatten into the weight layouts)
# ----------------------------------------------------------------------------
def _build_conv_toeplitz(w_np, width, padding):
    """(Cout,Cin,kH,kW) conv weight -> per-dy banded block-Toeplitz matrices
    T[dy] of shape (width*Cin, width*Cout); rows laid out as lane = w*Cin + c,
    cols as lane = w*Cout + c.  W-direction 'same' padding is the zero band."""
    cout, cin, khh, kww = w_np.shape
    t = np.zeros((khh, width * cin, width * cout), np.float32)
    for dy in range(khh):
        for w in range(width):
            for dx in range(kww):
                win = w + dx - padding
                if 0 <= win < width:
                    t[dy, win * cin:(win + 1) * cin, w * cout:(w + 1) * cout] = \
                        w_np[:, :, dy, dx].T
    return t


def _build_fc0_blocks(w_fc0_np, h_sp, w_sp, c):
    """Fold PyTorch's NCHW flatten (x.view(-1, C*H*W)) into the fc0 weight:
    G[h][w*C + ci, f] = W_fc0[f, ci*H*W + h*W + w]."""
    f0 = w_fc0_np.shape[0]
    g = np.zeros((h_sp, w_sp * c, f0), np.float32)
    for h in range(h_sp):
        for w in range(w_sp):
            for ci in range(c):
                g[h, w * c + ci, :] = w_fc0_np[:, ci * (h_sp * w_sp) + h * w_sp + w]
    return g


def init_params(key):
    """Deterministic parameters in native PyTorch layouts."""
    cin, c1, c2 = ENCODER_FILTER_NUM
    k0, k1 = ENCODER_KERNEL_SIZE
    x_dim, y_dim = compute_dim_sizes()
    flat = x_dim * y_dim * c2
    f0, f1 = ENCODER_FC_LAYERS
    ks = jax.random.split(key, 8)
    return {
        "conv0_w": 0.1 * jax.random.normal(ks[0], (c1, cin, k0, k0), jnp.float32),
        "conv0_b": 0.01 * jax.random.normal(ks[1], (c1,), jnp.float32),
        "conv1_w": 0.1 * jax.random.normal(ks[2], (c2, c1, k1, k1), jnp.float32),
        "conv1_b": 0.01 * jax.random.normal(ks[3], (c2,), jnp.float32),
        "fc0_w": 0.1 * jax.random.normal(ks[4], (f0, flat), jnp.float32),
        "fc0_b": 0.01 * jax.random.normal(ks[5], (f0,), jnp.float32),
        "fc1_w": 0.1 * jax.random.normal(ks[6], (f1, f0), jnp.float32),
        "fc1_b": 0.01 * jax.random.normal(ks[7], (f1,), jnp.float32),
    }


def pack_params(params):
    cin, c1, c2 = ENCODER_FILTER_NUM
    k0, _ = ENCODER_KERNEL_SIZE
    assert all(s == 1 for s in ENCODER_STRIDES)
    assert all(2 * p == k - 1 for k, p in zip(ENCODER_KERNEL_SIZE, ENCODER_PADDING))
    assert all(m == 2 for m in ENCODER_MAX_POOL_SIZE)
    w0 = YQUANTIZE                                  # conv0 in/out width ('same')
    w1 = w0 // 2                                    # conv1 in/out width
    x_dim, y_dim = compute_dim_sizes()              # final spatial dims (4, 4)
    assert params["fc0_w"].shape[1] == x_dim * y_dim * c2

    t0 = _build_conv_toeplitz(np.asarray(jax.device_get(params["conv0_w"])),
                              w0, ENCODER_PADDING[0])
    t1 = _build_conv_toeplitz(np.asarray(jax.device_get(params["conv1_w"])),
                              w1, ENCODER_PADDING[1])
    g0 = _build_fc0_blocks(np.asarray(jax.device_get(params["fc0_w"])),
                           x_dim, y_dim, c2)
    return {
        # taps concatenated along the contraction axis -> K = 3*W0*Cin = 192
        "t0cat": jnp.asarray(t0.reshape(k0 * w0 * cin, w0 * c1)),
        "b0": jnp.tile(params["conv0_b"], w0).reshape(1, w0 * c1),
        "t1": jnp.asarray(t1),                      # (3, W1*C1, W1*C2)
        "b1": jnp.tile(params["conv1_b"], w1).reshape(1, w1 * c2),
        "g0": jnp.asarray(g0),                      # (H2, W2*C2, F0)
        "bf0": params["fc0_b"].reshape(1, -1),
        "wf1": params["fc1_w"].T,                   # (F0, F1)
        "bf1": params["fc1_b"].reshape(1, -1),
    }


def _structural_constants(batch):
    """Batch/shape-dependent 0/1 selection matrices (built at trace time on the
    host; hoisted out of the kernel so no iota/compare runs on the VPU)."""
    _, c1, c2 = ENCODER_FILTER_NUM
    h0, w0 = XQUANTIZE, YQUANTIZE
    h1, w1 = h0 // 2, w0 // 2

    def wpool(width_in, c):                      # lane-pair max via 2 matmuls
        width_out = width_in // 2
        pe = np.zeros((width_in * c, width_out * c), np.float32)
        po = np.zeros_like(pe)
        for wp in range(width_out):
            for ci in range(c):
                pe[(2 * wp) * c + ci, wp * c + ci] = 1.0
                po[(2 * wp + 1) * c + ci, wp * c + ci] = 1.0
        return np.stack([pe, po])

    def hpool(n, h_in):                          # row-pair max via 2 matmuls
        h_out = h_in // 2
        se = np.zeros((n * h_out, n * h_in), np.float32)
        so = np.zeros_like(se)
        for b in range(n):
            for hp in range(h_out):
                se[b * h_out + hp, b * h_in + 2 * hp] = 1.0
                so[b * h_out + hp, b * h_in + 2 * hp + 1] = 1.0
        return np.stack([se, so])

    def shifts(n, h):                            # conv1 +-1 H-taps (zero band)
        dm = np.zeros((n * h, n * h), np.float32)
        dp = np.zeros_like(dm)
        for b in range(n):
            for r in range(h):
                if r >= 1:
                    dm[b * h + r, b * h + r - 1] = 1.0
                if r + 1 < h:
                    dp[b * h + r, b * h + r + 1] = 1.0
        return np.stack([dm, dp])

    def tail_sel(n, h_in):                       # fused H-pool + per-batch rows
        h_out = h_in // 2
        fe = np.zeros((h_out, n, n * h_in), np.float32)
        fo = np.zeros_like(fe)
        for hh in range(h_out):
            for b in range(n):
                fe[hh, b, b * h_in + 2 * hh] = 1.0
                fo[hh, b, b * h_in + 2 * hh + 1] = 1.0
        return fe, fo

    fe, fo = tail_sel(batch, h1)
    return {
        "wp0": jnp.asarray(wpool(w0, c1)),       # (2, W0*C1, W1*C1)
        "hp0": jnp.asarray(hpool(batch, h0)),    # (2, N*H1, N*H0)
        "dsh": jnp.asarray(shifts(batch, h1)),   # (2, N*H1, N*H1)
        "wp1": jnp.asarray(wpool(w1, c2)),       # (2, W1*C2, W2*C2)
        "fe": jnp.asarray(fe),                   # (H2, N, N*H1)
        "fo": jnp.asarray(fo),                   # (H2, N, N*H1)
    }


# ----------------------------------------------------------------------------
# Forward pass (mirrors EncoderVAE.forward) — one Pallas launch
# ----------------------------------------------------------------------------
def encoder_vae_forward(x_nchw, packed):
    n, cin, h0, w0 = x_nchw.shape
    assert (cin, h0, w0) == (ENCODER_FILTER_NUM[0], XQUANTIZE, YQUANTIZE)
    kh = ENCODER_KERNEL_SIZE[0]
    pad = ENCODER_PADDING[0]
    f1 = ENCODER_FC_LAYERS[-1]

    # Layout plumbing only (outside the kernel): NCHW -> sublane-dense
    # (N*H0, W0*Cin) rows, with the kh=3 dy-taps pre-shifted (zero H padding)
    # and lane-concatenated so conv0 is a single K=192 MXU matmul.
    xr = jnp.transpose(x_nchw, (0, 2, 3, 1)).reshape(n, h0, w0 * cin)
    xp = jnp.pad(xr, ((0, 0), (pad, pad), (0, 0)))
    x0cat = jnp.concatenate([xp[:, dy:dy + h0, :] for dy in range(kh)],
                            axis=-1).reshape(n * h0, kh * w0 * cin)

    consts = _structural_constants(n)            # trace-time, tiny constants
    vmem = pl.BlockSpec(memory_space=pltpu.MemorySpace.VMEM)
    return pl.pallas_call(
        _encoder_vae_fused_kernel,
        out_shape=jax.ShapeDtypeStruct((n, f1), jnp.float32),
        in_specs=[vmem] * 15,
        out_specs=vmem,
    )(x0cat, packed["t0cat"], packed["b0"],
      consts["wp0"], consts["hp0"], consts["dsh"],
      packed["t1"], packed["b1"], consts["wp1"],
      consts["fe"], consts["fo"],
      packed["g0"], packed["bf0"], packed["wf1"], packed["bf1"])


# ----------------------------------------------------------------------------
# Pure-JAX reference (for correctness check)
# ----------------------------------------------------------------------------
def _reference_forward(x, params):
    dn = ("NCHW", "OIHW", "NCHW")
    hp = jax.lax.Precision.HIGHEST
    y = jax.lax.conv_general_dilated(x, params["conv0_w"], (1, 1), ((1, 1), (1, 1)),
                                     dimension_numbers=dn, precision=hp)
    y = jax.nn.relu(y + params["conv0_b"][None, :, None, None])
    y = jax.lax.reduce_window(y, -jnp.inf, jax.lax.max, (1, 1, 2, 2), (1, 1, 2, 2),
                              "VALID")
    y = jax.lax.conv_general_dilated(y, params["conv1_w"], (1, 1), ((1, 1), (1, 1)),
                                     dimension_numbers=dn, precision=hp)
    y = jax.nn.relu(y + params["conv1_b"][None, :, None, None])
    y = jax.lax.reduce_window(y, -jnp.inf, jax.lax.max, (1, 1, 2, 2), (1, 1, 2, 2),
                              "VALID")
    y = y.reshape(y.shape[0], -1)
    y = jax.nn.relu(y @ params["fc0_w"].T + params["fc0_b"])
    return y @ params["fc1_w"].T + params["fc1_b"]


# ----------------------------------------------------------------------------
if __name__ == "__main__":
    key = jax.random.PRNGKey(0)
    pkey, xkey = jax.random.split(key)
    params = init_params(pkey)
    packed = pack_params(params)          # one-time host-side weight repack

    batch = 2
    x = jax.random.normal(
        xkey, (batch, ENCODER_FILTER_NUM[0], XQUANTIZE, YQUANTIZE), jnp.float32)

    fwd = jax.jit(encoder_vae_forward)
    out = jax.block_until_ready(fwd(x, packed))

    expected = (batch, ENCODER_FC_LAYERS[-1])
    assert out.shape == expected, f"got {out.shape}, want {expected}"
    assert bool(jnp.all(jnp.isfinite(out)))

    ref = jax.block_until_ready(_reference_forward(x, params))
    err = float(jnp.max(jnp.abs(out - ref)))
    assert err < 5e-2, f"mismatch vs pure-JAX reference: max abs err = {err}"
    print("KERNEL_OK")
</pallas_src>

<mosaic_0001>
module attributes {stable_mosaic.version = 11 : i64} {
  func.func @_encoder_vae_fused_kernel(%arg0: memref<32x192xf32, #tpu.memory_space<vmem>>, %arg1: memref<192x128xf32, #tpu.memory_space<vmem>>, %arg2: memref<1x128xf32, #tpu.memory_space<vmem>>, %arg3: memref<2x128x64xf32, #tpu.memory_space<vmem>>, %arg4: memref<2x16x32xf32, #tpu.memory_space<vmem>>, %arg5: memref<2x16x16xf32, #tpu.memory_space<vmem>>, %arg6: memref<3x64x128xf32, #tpu.memory_space<vmem>>, %arg7: memref<1x128xf32, #tpu.memory_space<vmem>>, %arg8: memref<2x128x64xf32, #tpu.memory_space<vmem>>, %arg9: memref<4x2x16xf32, #tpu.memory_space<vmem>>, %arg10: memref<4x2x16xf32, #tpu.memory_space<vmem>>, %arg11: memref<4x64x32xf32, #tpu.memory_space<vmem>>, %arg12: memref<1x32xf32, #tpu.memory_space<vmem>>, %arg13: memref<32x16xf32, #tpu.memory_space<vmem>>, %arg14: memref<1x16xf32, #tpu.memory_space<vmem>>, %arg15: memref<2x16xf32, #tpu.memory_space<vmem>>) attributes {dimension_semantics = [], scalar_prefetch = 0 : i64, scratch_operands = 0 : i64, tpu.core_type = #tpu.core_type<tc>} {
    %c0 = arith.constant 0 : index
    %c0_0 = arith.constant 0 : index
    %0 = vector.load %arg0[%c0, %c0_0] : memref<32x192xf32, #tpu.memory_space<vmem>>, vector<32x192xf32>
    %c0_1 = arith.constant 0 : index
    %c0_2 = arith.constant 0 : index
    %1 = vector.load %arg1[%c0_1, %c0_2] : memref<192x128xf32, #tpu.memory_space<vmem>>, vector<192x128xf32>
    %cst = arith.constant dense<0.000000e+00> : vector<32x128xf32>
    %2 = tpu.matmul %0, %1, %cst {dimension_numbers = #tpu.dot_dimension_numbers<[1], [0], [0], [1], [0, 0, 1, 1], [], []>} : vector<32x192xf32>, vector<192x128xf32>, vector<32x128xf32> -> vector<32x128xf32>
    %c0_3 = arith.constant 0 : index
    %c0_4 = arith.constant 0 : index
    %3 = vector.load %arg2[%c0_3, %c0_4] : memref<1x128xf32, #tpu.memory_space<vmem>>, vector<1x128xf32>
    %4 = vector.broadcast %3 : vector<1x128xf32> to vector<32x128xf32>
    %5 = arith.addf %2, %4 : vector<32x128xf32>
    %cst_5 = arith.constant 0.000000e+00 : f32
    %6 = vector.broadcast %cst_5 : f32 to vector<32x128xf32>
    %7 = arith.maximumf %5, %6 : vector<32x128xf32>
    %c0_6 = arith.constant 0 : index
    %c0_7 = arith.constant 0 : index
    %c0_8 = arith.constant 0 : index
    %8 = vector.load %arg3[%c0_6, %c0_7, %c0_8] : memref<2x128x64xf32, #tpu.memory_space<vmem>>, vector<1x128x64xf32>
    %9 = vector.shape_cast %8 : vector<1x128x64xf32> to vector<128x64xf32>
    %cst_9 = arith.constant dense<0.000000e+00> : vector<32x64xf32>
    %10 = tpu.matmul %7, %9, %cst_9 {dimension_numbers = #tpu.dot_dimension_numbers<[1], [0], [0], [1], [0, 0, 1, 1], [], []>} : vector<32x128xf32>, vector<128x64xf32>, vector<32x64xf32> -> vector<32x64xf32>
    %c1 = arith.constant 1 : index
    %c0_10 = arith.constant 0 : index
    %c0_11 = arith.constant 0 : index
    %11 = vector.load %arg3[%c1, %c0_10, %c0_11] : memref<2x128x64xf32, #tpu.memory_space<vmem>>, vector<1x128x64xf32>
    %12 = vector.shape_cast %11 : vector<1x128x64xf32> to vector<128x64xf32>
    %cst_12 = arith.constant dense<0.000000e+00> : vector<32x64xf32>
    %13 = tpu.matmul %7, %12, %cst_12 {dimension_numbers = #tpu.dot_dimension_numbers<[1], [0], [0], [1], [0, 0, 1, 1], [], []>} : vector<32x128xf32>, vector<128x64xf32>, vector<32x64xf32> -> vector<32x64xf32>
    %14 = arith.maximumf %10, %13 : vector<32x64xf32>
    %c0_13 = arith.constant 0 : index
    %c0_14 = arith.constant 0 : index
    %c0_15 = arith.constant 0 : index
    %15 = vector.load %arg4[%c0_13, %c0_14, %c0_15] : memref<2x16x32xf32, #tpu.memory_space<vmem>>, vector<1x16x32xf32>
    %16 = vector.shape_cast %15 : vector<1x16x32xf32> to vector<16x32xf32>
    %cst_16 = arith.constant dense<0.000000e+00> : vector<16x64xf32>
    %17 = tpu.matmul %16, %14, %cst_16 {dimension_numbers = #tpu.dot_dimension_numbers<[1], [0], [0], [1], [0, 0, 1, 1], [], []>} : vector<16x32xf32>, vector<32x64xf32>, vector<16x64xf32> -> vector<16x64xf32>
    %c1_17 = arith.constant 1 : index
    %c0_18 = arith.constant 0 : index
    %c0_19 = arith.constant 0 : index
    %18 = vector.load %arg4[%c1_17, %c0_18, %c0_19] : memref<2x16x32xf32, #tpu.memory_space<vmem>>, vector<1x16x32xf32>
    %19 = vector.shape_cast %18 : vector<1x16x32xf32> to vector<16x32xf32>
    %cst_20 = arith.constant dense<0.000000e+00> : vector<16x64xf32>
    %20 = tpu.matmul %19, %14, %cst_20 {dimension_numbers = #tpu.dot_dimension_numbers<[1], [0], [0], [1], [0, 0, 1, 1], [], []>} : vector<16x32xf32>, vector<32x64xf32>, vector<16x64xf32> -> vector<16x64xf32>
    %21 = arith.maximumf %17, %20 : vector<16x64xf32>
    %c1_21 = arith.constant 1 : index
    %c0_22 = arith.constant 0 : index
    %c0_23 = arith.constant 0 : index
    %22 = vector.load %arg6[%c1_21, %c0_22, %c0_23] : memref<3x64x128xf32, #tpu.memory_space<vmem>>, vector<1x64x128xf32>
    %23 = vector.shape_cast %22 : vector<1x64x128xf32> to vector<64x128xf32>
    %cst_24 = arith.constant dense<0.000000e+00> : vector<16x128xf32>
    %24 = tpu.matmul %21, %23, %cst_24 {dimension_numbers = #tpu.dot_dimension_numbers<[1], [0], [0], [1], [0, 0, 1, 1], [], []>} : vector<16x64xf32>, vector<64x128xf32>, vector<16x128xf32> -> vector<16x128xf32>
    %c0_25 = arith.constant 0 : index
    %c0_26 = arith.constant 0 : index
    %c0_27 = arith.constant 0 : index
    %25 = vector.load %arg5[%c0_25, %c0_26, %c0_27] : memref<2x16x16xf32, #tpu.memory_space<vmem>>, vector<1x16x16xf32>
    %26 = vector.shape_cast %25 : vector<1x16x16xf32> to vector<16x16xf32>
    %cst_28 = arith.constant dense<0.000000e+00> : vector<16x64xf32>
    %27 = tpu.matmul %26, %21, %cst_28 {dimension_numbers = #tpu.dot_dimension_numbers<[1], [0], [0], [1], [0, 0, 1, 1], [], []>} : vector<16x16xf32>, vector<16x64xf32>, vector<16x64xf32> -> vector<16x64xf32>
    %c0_29 = arith.constant 0 : index
    %c0_30 = arith.constant 0 : index
    %c0_31 = arith.constant 0 : index
    %28 = vector.load %arg6[%c0_29, %c0_30, %c0_31] : memref<3x64x128xf32, #tpu.memory_space<vmem>>, vector<1x64x128xf32>
    %29 = vector.shape_cast %28 : vector<1x64x128xf32> to vector<64x128xf32>
    %cst_32 = arith.constant dense<0.000000e+00> : vector<16x128xf32>
    %30 = tpu.matmul %27, %29, %cst_32 {dimension_numbers = #tpu.dot_dimension_numbers<[1], [0], [0], [1], [0, 0, 1, 1], [], []>} : vector<16x64xf32>, vector<64x128xf32>, vector<16x128xf32> -> vector<16x128xf32>
    %31 = arith.addf %24, %30 : vector<16x128xf32>
    %c1_33 = arith.constant 1 : index
    %c0_34 = arith.constant 0 : index
    %c0_35 = arith.constant 0 : index
    %32 = vector.load %arg5[%c1_33, %c0_34, %c0_35] : memref<2x16x16xf32, #tpu.memory_space<vmem>>, vector<1x16x16xf32>
    %33 = vector.shape_cast %32 : vector<1x16x16xf32> to vector<16x16xf32>
    %cst_36 = arith.constant dense<0.000000e+00> : vector<16x64xf32>
    %34 = tpu.matmul %33, %21, %cst_36 {dimension_numbers = #tpu.dot_dimension_numbers<[1], [0], [0], [1], [0, 0, 1, 1], [], []>} : vector<16x16xf32>, vector<16x64xf32>, vector<16x64xf32> -> vector<16x64xf32>
    %c2 = arith.constant 2 : index
    %c0_37 = arith.constant 0 : index
    %c0_38 = arith.constant 0 : index
    %35 = vector.load %arg6[%c2, %c0_37, %c0_38] : memref<3x64x128xf32, #tpu.memory_space<vmem>>, vector<1x64x128xf32>
    %36 = vector.shape_cast %35 : vector<1x64x128xf32> to vector<64x128xf32>
    %cst_39 = arith.constant dense<0.000000e+00> : vector<16x128xf32>
    %37 = tpu.matmul %34, %36, %cst_39 {dimension_numbers = #tpu.dot_dimension_numbers<[1], [0], [0], [1], [0, 0, 1, 1], [], []>} : vector<16x64xf32>, vector<64x128xf32>, vector<16x128xf32> -> vector<16x128xf32>
    %38 = arith.addf %31, %37 : vector<16x128xf32>
    %c0_40 = arith.constant 0 : index
    %c0_41 = arith.constant 0 : index
    %39 = vector.load %arg7[%c0_40, %c0_41] : memref<1x128xf32, #tpu.memory_space<vmem>>, vector<1x128xf32>
    %40 = vector.broadcast %39 : vector<1x128xf32> to vector<16x128xf32>
    %41 = arith.addf %38, %40 : vector<16x128xf32>
    %cst_42 = arith.constant 0.000000e+00 : f32
    %42 = vector.broadcast %cst_42 : f32 to vector<16x128xf32>
    %43 = arith.maximumf %41, %42 : vector<16x128xf32>
    %c0_43 = arith.constant 0 : index
    %c0_44 = arith.constant 0 : index
    %c0_45 = arith.constant 0 : index
    %44 = vector.load %arg8[%c0_43, %c0_44, %c0_45] : memref<2x128x64xf32, #tpu.memory_space<vmem>>, vector<1x128x64xf32>
    %45 = vector.shape_cast %44 : vector<1x128x64xf32> to vector<128x64xf32>
    %cst_46 = arith.constant dense<0.000000e+00> : vector<16x64xf32>
    %46 = tpu.matmul %43, %45, %cst_46 {dimension_numbers = #tpu.dot_dimension_numbers<[1], [0], [0], [1], [0, 0, 1, 1], [], []>} : vector<16x128xf32>, vector<128x64xf32>, vector<16x64xf32> -> vector<16x64xf32>
    %c1_47 = arith.constant 1 : index
    %c0_48 = arith.constant 0 : index
    %c0_49 = arith.constant 0 : index
    %47 = vector.load %arg8[%c1_47, %c0_48, %c0_49] : memref<2x128x64xf32, #tpu.memory_space<vmem>>, vector<1x128x64xf32>
    %48 = vector.shape_cast %47 : vector<1x128x64xf32> to vector<128x64xf32>
    %cst_50 = arith.constant dense<0.000000e+00> : vector<16x64xf32>
    %49 = tpu.matmul %43, %48, %cst_50 {dimension_numbers = #tpu.dot_dimension_numbers<[1], [0], [0], [1], [0, 0, 1, 1], [], []>} : vector<16x128xf32>, vector<128x64xf32>, vector<16x64xf32> -> vector<16x64xf32>
    %50 = arith.maximumf %46, %49 : vector<16x64xf32>
    %c0_51 = arith.constant 0 : index
    %c0_52 = arith.constant 0 : index
    %c0_53 = arith.constant 0 : index
    %51 = vector.load %arg9[%c0_51, %c0_52, %c0_53] : memref<4x2x16xf32, #tpu.memory_space<vmem>>, vector<1x2x16xf32>
    %52 = vector.shape_cast %51 : vector<1x2x16xf32> to vector<2x16xf32>
    %cst_54 = arith.constant dense<0.000000e+00> : vector<2x64xf32>
    %53 = tpu.matmul %52, %50, %cst_54 {dimension_numbers = #tpu.dot_dimension_numbers<[1], [0], [0], [1], [0, 0, 1, 1], [], []>} : vector<2x16xf32>, vector<16x64xf32>, vector<2x64xf32> -> vector<2x64xf32>
    %c0_55 = arith.constant 0 : index
    %c0_56 = arith.constant 0 : index
    %c0_57 = arith.constant 0 : index
    %54 = vector.load %arg10[%c0_55, %c0_56, %c0_57] : memref<4x2x16xf32, #tpu.memory_space<vmem>>, vector<1x2x16xf32>
    %55 = vector.shape_cast %54 : vector<1x2x16xf32> to vector<2x16xf32>
    %cst_58 = arith.constant dense<0.000000e+00> : vector<2x64xf32>
    %56 = tpu.matmul %55, %50, %cst_58 {dimension_numbers = #tpu.dot_dimension_numbers<[1], [0], [0], [1], [0, 0, 1, 1], [], []>} : vector<2x16xf32>, vector<16x64xf32>, vector<2x64xf32> -> vector<2x64xf32>
    %57 = arith.maximumf %53, %56 : vector<2x64xf32>
    %c0_59 = arith.constant 0 : index
    %c0_60 = arith.constant 0 : index
    %c0_61 = arith.constant 0 : index
    %58 = vector.load %arg11[%c0_59, %c0_60, %c0_61] : memref<4x64x32xf32, #tpu.memory_space<vmem>>, vector<1x64x32xf32>
    %59 = vector.shape_cast %58 : vector<1x64x32xf32> to vector<64x32xf32>
    %cst_62 = arith.constant dense<0.000000e+00> : vector<2x32xf32>
    %60 = tpu.matmul %57, %59, %cst_62 {dimension_numbers = #tpu.dot_dimension_numbers<[1], [0], [0], [1], [0, 0, 1, 1], [], []>} : vector<2x64xf32>, vector<64x32xf32>, vector<2x32xf32> -> vector<2x32xf32>
    %c1_63 = arith.constant 1 : index
    %c0_64 = arith.constant 0 : index
    %c0_65 = arith.constant 0 : index
    %61 = vector.load %arg9[%c1_63, %c0_64, %c0_65] : memref<4x2x16xf32, #tpu.memory_space<vmem>>, vector<1x2x16xf32>
    %62 = vector.shape_cast %61 : vector<1x2x16xf32> to vector<2x16xf32>
    %cst_66 = arith.constant dense<0.000000e+00> : vector<2x64xf32>
    %63 = tpu.matmul %62, %50, %cst_66 {dimension_numbers = #tpu.dot_dimension_numbers<[1], [0], [0], [1], [0, 0, 1, 1], [], []>} : vector<2x16xf32>, vector<16x64xf32>, vector<2x64xf32> -> vector<2x64xf32>
    %c1_67 = arith.constant 1 : index
    %c0_68 = arith.constant 0 : index
    %c0_69 = arith.constant 0 : index
    %64 = vector.load %arg10[%c1_67, %c0_68, %c0_69] : memref<4x2x16xf32, #tpu.memory_space<vmem>>, vector<1x2x16xf32>
    %65 = vector.shape_cast %64 : vector<1x2x16xf32> to vector<2x16xf32>
    %cst_70 = arith.constant dense<0.000000e+00> : vector<2x64xf32>
    %66 = tpu.matmul %65, %50, %cst_70 {dimension_numbers = #tpu.dot_dimension_numbers<[1], [0], [0], [1], [0, 0, 1, 1], [], []>} : vector<2x16xf32>, vector<16x64xf32>, vector<2x64xf32> -> vector<2x64xf32>
    %67 = arith.maximumf %63, %66 : vector<2x64xf32>
    %c1_71 = arith.constant 1 : index
    %c0_72 = arith.constant 0 : index
    %c0_73 = arith.constant 0 : index
    %68 = vector.load %arg11[%c1_71, %c0_72, %c0_73] : memref<4x64x32xf32, #tpu.memory_space<vmem>>, vector<1x64x32xf32>
    %69 = vector.shape_cast %68 : vector<1x64x32xf32> to vector<64x32xf32>
    %cst_74 = arith.constant dense<0.000000e+00> : vector<2x32xf32>
    %70 = tpu.matmul %67, %69, %cst_74 {dimension_numbers = #tpu.dot_dimension_numbers<[1], [0], [0], [1], [0, 0, 1, 1], [], []>} : vector<2x64xf32>, vector<64x32xf32>, vector<2x32xf32> -> vector<2x32xf32>
    %71 = arith.addf %60, %70 : vector<2x32xf32>
    %c2_75 = arith.constant 2 : index
    %c0_76 = arith.constant 0 : index
    %c0_77 = arith.constant 0 : index
    %72 = vector.load %arg9[%c2_75, %c0_76, %c0_77] : memref<4x2x16xf32, #tpu.memory_space<vmem>>, vector<1x2x16xf32>
    %73 = vector.shape_cast %72 : vector<1x2x16xf32> to vector<2x16xf32>
    %cst_78 = arith.constant dense<0.000000e+00> : vector<2x64xf32>
    %74 = tpu.matmul %73, %50, %cst_78 {dimension_numbers = #tpu.dot_dimension_numbers<[1], [0], [0], [1], [0, 0, 1, 1], [], []>} : vector<2x16xf32>, vector<16x64xf32>, vector<2x64xf32> -> vector<2x64xf32>
    %c2_79 = arith.constant 2 : index
    %c0_80 = arith.constant 0 : index
    %c0_81 = arith.constant 0 : index
    %75 = vector.load %arg10[%c2_79, %c0_80, %c0_81] : memref<4x2x16xf32, #tpu.memory_space<vmem>>, vector<1x2x16xf32>
    %76 = vector.shape_cast %75 : vector<1x2x16xf32> to vector<2x16xf32>
    %cst_82 = arith.constant dense<0.000000e+00> : vector<2x64xf32>
    %77 = tpu.matmul %76, %50, %cst_82 {dimension_numbers = #tpu.dot_dimension_numbers<[1], [0], [0], [1], [0, 0, 1, 1], [], []>} : vector<2x16xf32>, vector<16x64xf32>, vector<2x64xf32> -> vector<2x64xf32>
    %78 = arith.maximumf %74, %77 : vector<2x64xf32>
    %c2_83 = arith.constant 2 : index
    %c0_84 = arith.constant 0 : index
    %c0_85 = arith.constant 0 : index
    %79 = vector.load %arg11[%c2_83, %c0_84, %c0_85] : memref<4x64x32xf32, #tpu.memory_space<vmem>>, vector<1x64x32xf32>
    %80 = vector.shape_cast %79 : vector<1x64x32xf32> to vector<64x32xf32>
    %cst_86 = arith.constant dense<0.000000e+00> : vector<2x32xf32>
    %81 = tpu.matmul %78, %80, %cst_86 {dimension_numbers = #tpu.dot_dimension_numbers<[1], [0], [0], [1], [0, 0, 1, 1], [], []>} : vector<2x64xf32>, vector<64x32xf32>, vector<2x32xf32> -> vector<2x32xf32>
    %82 = arith.addf %71, %81 : vector<2x32xf32>
    %c3 = arith.constant 3 : index
    %c0_87 = arith.constant 0 : index
    %c0_88 = arith.constant 0 : index
    %83 = vector.load %arg9[%c3, %c0_87, %c0_88] : memref<4x2x16xf32, #tpu.memory_space<vmem>>, vector<1x2x16xf32>
    %84 = vector.shape_cast %83 : vector<1x2x16xf32> to vector<2x16xf32>
    %cst_89 = arith.constant dense<0.000000e+00> : vector<2x64xf32>
    %85 = tpu.matmul %84, %50, %cst_89 {dimension_numbers = #tpu.dot_dimension_numbers<[1], [0], [0], [1], [0, 0, 1, 1], [], []>} : vector<2x16xf32>, vector<16x64xf32>, vector<2x64xf32> -> vector<2x64xf32>
    %c3_90 = arith.constant 3 : index
    %c0_91 = arith.constant 0 : index
    %c0_92 = arith.constant 0 : index
    %86 = vector.load %arg10[%c3_90, %c0_91, %c0_92] : memref<4x2x16xf32, #tpu.memory_space<vmem>>, vector<1x2x16xf32>
    %87 = vector.shape_cast %86 : vector<1x2x16xf32> to vector<2x16xf32>
    %cst_93 = arith.constant dense<0.000000e+00> : vector<2x64xf32>
    %88 = tpu.matmul %87, %50, %cst_93 {dimension_numbers = #tpu.dot_dimension_numbers<[1], [0], [0], [1], [0, 0, 1, 1], [], []>} : vector<2x16xf32>, vector<16x64xf32>, vector<2x64xf32> -> vector<2x64xf32>
    %89 = arith.maximumf %85, %88 : vector<2x64xf32>
    %c3_94 = arith.constant 3 : index
    %c0_95 = arith.constant 0 : index
    %c0_96 = arith.constant 0 : index
    %90 = vector.load %arg11[%c3_94, %c0_95, %c0_96] : memref<4x64x32xf32, #tpu.memory_space<vmem>>, vector<1x64x32xf32>
    %91 = vector.shape_cast %90 : vector<1x64x32xf32> to vector<64x32xf32>
    %cst_97 = arith.constant dense<0.000000e+00> : vector<2x32xf32>
    %92 = tpu.matmul %89, %91, %cst_97 {dimension_numbers = #tpu.dot_dimension_numbers<[1], [0], [0], [1], [0, 0, 1, 1], [], []>} : vector<2x64xf32>, vector<64x32xf32>, vector<2x32xf32> -> vector<2x32xf32>
    %93 = arith.addf %82, %92 : vector<2x32xf32>
    %c0_98 = arith.constant 0 : index
    %c0_99 = arith.constant 0 : index
    %94 = vector.load %arg12[%c0_98, %c0_99] : memref<1x32xf32, #tpu.memory_space<vmem>>, vector<1x32xf32>
    %95 = vector.broadcast %94 : vector<1x32xf32> to vector<2x32xf32>
    %96 = arith.addf %93, %95 : vector<2x32xf32>
    %cst_100 = arith.constant 0.000000e+00 : f32
    %97 = vector.broadcast %cst_100 : f32 to vector<2x32xf32>
    %98 = arith.maximumf %96, %97 : vector<2x32xf32>
    %c0_101 = arith.constant 0 : index
    %c0_102 = arith.constant 0 : index
    %99 = vector.load %arg13[%c0_101, %c0_102] : memref<32x16xf32, #tpu.memory_space<vmem>>, vector<32x16xf32>
    %cst_103 = arith.constant dense<0.000000e+00> : vector<2x16xf32>
    %100 = tpu.matmul %98, %99, %cst_103 {dimension_numbers = #tpu.dot_dimension_numbers<[1], [0], [0], [1], [0, 0, 1, 1], [], []>} : vector<2x32xf32>, vector<32x16xf32>, vector<2x16xf32> -> vector<2x16xf32>
    %c0_104 = arith.constant 0 : index
    %c0_105 = arith.constant 0 : index
    %101 = vector.load %arg14[%c0_104, %c0_105] : memref<1x16xf32, #tpu.memory_space<vmem>>, vector<1x16xf32>
    %102 = vector.broadcast %101 : vector<1x16xf32> to vector<2x16xf32>
    %103 = arith.addf %100, %102 : vector<2x16xf32>
    %c0_106 = arith.constant 0 : index
    %c0_107 = arith.constant 0 : index
    %104 = vector.load %arg15[%c0_106, %c0_107] : memref<2x16xf32, #tpu.memory_space<vmem>>, vector<2x16xf32>
    tpu.vector_store %arg15[%c0_106, %c0_107], %103 {strides = array<i32>} : memref<2x16xf32, #tpu.memory_space<vmem>>, vector<2x16xf32>,
    return
  }
}

</mosaic_0001>

<bundles_post_ra>
// kernel: encoder_vae_forward.1
= control target key start
LH: loop header
LB: loop body
LE: loop exit
PB: predicated region body
PF: predicated region fallthrough
CT: control target
= control target key end

     0   :  { %s1764_s0 = inlined_call_operand.vmem [shape: f32[32,192], index: 0, kind: input, shape index: {}]   ;;  %s1765_s1 = inlined_call_operand.vmem [shape: f32[192,128], index: 1, kind: input, shape index: {}]   ;;  %s1766_s2 = inlined_call_operand.vmem [shape: f32[1,128], index: 2, kind: input, shape index: {}]   ;;  %s1767_s3 = inlined_call_operand.vmem [shape: f32[2,128,64], index: 3, kind: input, shape index: {}]   ;;  %s1768_s4 = inlined_call_operand.vmem [shape: f32[2,16,32], index: 4, kind: input, shape index: {}]   ;;  %s1769_s5 = inlined_call_operand.vmem [shape: f32[2,16,16], index: 5, kind: input, shape index: {}]   ;;  %s1770_s6 = inlined_call_operand.vmem [shape: f32[3,64,128], index: 6, kind: input, shape index: {}]   ;;  %s1771_s7 = inlined_call_operand.vmem [shape: f32[1,128], index: 7, kind: input, shape index: {}]   ;;  %s1772_s8 = inlined_call_operand.vmem [shape: f32[2,128,64], index: 8, kind: input, shape index: {}]   ;;  %s1773_s9 = inlined_call_operand.vmem [shape: f32[4,2,16], index: 9, kind: input, shape index: {}]   ;;  %s1774_s10 = inlined_call_operand.vmem [shape: f32[4,2,16], index: 10, kind: input, shape index: {}]   ;;  %s1775_s11 = inlined_call_operand.vmem [shape: f32[4,64,32], index: 11, kind: input, shape index: {}]   ;;  %s1776_s12 = inlined_call_operand.vmem [shape: f32[1,32], index: 12, kind: input, shape index: {}]   ;;  %s1777_s13 = inlined_call_operand.vmem [shape: f32[32,16], index: 13, kind: input, shape index: {}]   ;;  %s1778_s14 = inlined_call_operand.vmem [shape: f32[1,16], index: 14, kind: input, shape index: {}]   ;;  %s1779_s15 = inlined_call_operand.hbm [shape: f32[2,16], index: 15, kind: output, shape index: {}]  }
   0x1   :  { %v74_v0 = vld [vmem:[%s1765_s1 + $0x78] sm:$0xff]  ;;  %v73_v1 = vld [vmem:[%s1765_s1 + $0x70] sm:$0xff]  ;;  %v72_v2 = vld [vmem:[%s1765_s1 + $0x68] sm:$0xff] }
   0x2   :  { %100 = vmatpush.msra.mxu0 %v74_v0  ;;  %v82_v3 = vld [vmem:[%s1765_s1 + $0xb8] sm:$0xff]  ;;  %v71_v4 = vld [vmem:[%s1765_s1 + $0x60] sm:$0xff]  ;;  %v81_v5 = vld [vmem:[%s1765_s1 + $0xb0] sm:$0xff] }
   0x3   :  { %137 = vmatpush.msra.mxu1 %v82_v3  ;;  %v80_v6 = vld [vmem:[%s1765_s1 + $0xa8] sm:$0xff]  ;;  %v70_v7 = vld [vmem:[%s1765_s1 + $0x58] sm:$0xff]  ;;  %v79_v8 = vld [vmem:[%s1765_s1 + $0xa0] sm:$0xff] }
   0x4   :  { %101 = vmatpush.msra.mxu0 %v73_v1  ;;  %v69_v9 = vld [vmem:[%s1765_s1 + $0x50] sm:$0xff]  ;;  %v68_v10 = vld [vmem:[%s1765_s1 + $0x48] sm:$0xff]  ;;  %v78_v11 = vld [vmem:[%s1765_s1 + $0x98] sm:$0xff] }
   0x5   :  { %138 = vmatpush.msra.mxu1 %v81_v5  ;;  %v77_v12 = vld [vmem:[%s1765_s1 + $0x90] sm:$0xff] }
   0x6   :  { %102 = vmatpush.msra.mxu0 %v72_v2 }
   0x7   :  { %139 = vmatpush.msra.mxu1 %v80_v6 }
   0x8   :  { %103 = vmatpush.msra.mxu0 %v71_v4 }
   0x9   :  { %140 = vmatpush.msra.mxu1 %v79_v8 }
   0xa   :  { %104 = vmatpush.msra.mxu0 %v70_v7 }
   0xc   :  { %105 = vmatpush.msra.mxu0 %v69_v9 }
   0xd   :  { %20 = vsyncpa [#allocation3], 0  ;;  %v67_v13 = vld [vmem:[%s1765_s1 + $0x40] sm:$0xff]  ;;  %141 = vmatpush.msra.mxu1 %v78_v11  ;;  %v76_v14 = vld [vmem:[%s1765_s1 + $0x88] sm:$0xff]  ;;  %vm87_vm0 = vcmask 523264   ;;  %vm259_vm1 = vcmask 261120  }
   0xe   :  { %106 = vmatpush.msra.mxu0 %v68_v10  ;;  %v66_v15 = vld [vmem:[%s1765_s1 + $0x38] sm:$0xff]  ;;  %v75_v16 = vld [vmem:[%s1765_s1 + $0x80] sm:$0xff]  ;;  %v65_v17 = vld [vmem:[%s1765_s1 + $0x30] sm:$0xff]  ;;  %vm334_vm2 = vcmask 130048   ;;  %s968_s21 = sshll.u32 %s1779_s15, 4  ;;  %vm959_vm3 = vcmask 123904   ;;  %s969_s21 = int_to_ptr.hbm [resolvable:$true] %s968_s21 }
   0xf   :  { %142 = vmatpush.msra.mxu1 %v77_v12  ;;  %v52_v18 = vld [vmem:[%s1764_s0 + $0x8] sm:$0xff]  ;;  %v63_v20 = vld [vmem:[%s1765_s1 + $0x20] sm:$0xff]  ;;  %v62_v21 = vld [vmem:[%s1765_s1 + $0x18] sm:$0xff] }
  0x10   :  { %107 = vmatpush.msra.mxu0 %v67_v13  ;;  %v64_v19 = vld [vmem:[%s1765_s1 + $0x28] sm:$0xff]  ;;  %v61_v22 = vld [vmem:[%s1765_s1 + $0x10] sm:$0xff]  ;;  %v54_v23 = vld [vmem:[%s1764_s0 + $0x18] sm:$0xff] }
  0x11   :  { %143 = vmatpush.msra.mxu1 %v76_v14  ;;  %v177_v24 = vld [vmem:[%s1767_s3 + $0x78] sm:$0xff]  ;;  %v176_v26 = vld [vmem:[%s1767_s3 + $0x70] sm:$0xff]  ;;  %v60_v28 = vld [vmem:[%s1765_s1 + $0x8] sm:$0xff] }
  0x12   :  { %108 = vmatpush.msra.mxu0 %v66_v15  ;;  %v996_v25 = vld [vmem:[%s1767_s3 + $0xf8] sm:$0xff]  ;;  %178 = vmatpush.msra.mxu2 %v177_v24  ;;  %v995_v27 = vld [vmem:[%s1767_s3 + $0xf0] sm:$0xff]  ;;  %v175_v29 = vld [vmem:[%s1767_s3 + $0x68] sm:$0xff] }
  0x13   :  { %144 = vmatpush.msra.mxu1 %v75_v16  ;;  %224 = vmatpush.msra.mxu3 %v996_v25  ;;  %v994_v30 = vld [vmem:[%s1767_s3 + $0xe8] sm:$0xff]  ;;  %v59_v31 = vld [vmem:[%s1765_s1] sm:$0xff]  ;;  %v173_v35 = vld [vmem:[%s1767_s3 + $0x58] sm:$0xff] }
  0x14   :  { %109 = vmatpush.msra.mxu0 %v65_v17  ;;  %977 = vmatmul.msk.f32.vlgmr.msra.gmra.mxu1 %vm87_vm0, %v52_v18  ;;  %v51_v32 = vld [vmem:[%s1764_s0] sm:$0xff]  ;;  %v56_v36 = vld [vmem:[%s1764_s0 + $0x28] sm:$0xff]  ;;  %v992_v37 = vld [vmem:[%s1767_s3 + $0xd8] sm:$0xff] }
  0x15   :  { %179 = vmatpush.msra.mxu2 %v176_v26  ;;  %225 = vmatpush.msra.mxu3 %v995_v27  ;;  %v174_v33 = vld [vmem:[%s1767_s3 + $0x60] sm:$0xff]  ;;  %v172_v38 = vld [vmem:[%s1767_s3 + $0x50] sm:$0xff]  ;;  %v171_v40 = vld [vmem:[%s1767_s3 + $0x48] sm:$0xff] }
  0x16   :  { %110 = vmatpush.msra.mxu0 %v64_v19  ;;  %v993_v34 = vld [vmem:[%s1767_s3 + $0xe0] sm:$0xff]  ;;  %v991_v39 = vld [vmem:[%s1767_s3 + $0xd0] sm:$0xff]  ;;  %v990_v41 = vld [vmem:[%s1767_s3 + $0xc8] sm:$0xff] }
  0x17   :  { %180 = vmatpush.msra.mxu2 %v175_v29  ;;  %226 = vmatpush.msra.mxu3 %v994_v30  ;;  %v53_v42 = vld [vmem:[%s1764_s0 + $0x10] sm:$0xff]  ;;  %v170_v43 = vld [vmem:[%s1767_s3 + $0x40] sm:$0xff]  ;;  %v169_v45 = vld [vmem:[%s1767_s3 + $0x38] sm:$0xff] }
  0x18   :  { %111 = vmatpush.msra.mxu0 %v63_v20  ;;  %v989_v44 = vld [vmem:[%s1767_s3 + $0xc0] sm:$0xff]  ;;  %v58_v46 = vld [vmem:[%s1764_s0 + $0x38] sm:$0xff]  ;;  %v168_v48 = vld [vmem:[%s1767_s3 + $0x30] sm:$0xff] }
  0x19   :  { %181 = vmatpush.msra.mxu2 %v174_v33  ;;  %227 = vmatpush.msra.mxu3 %v993_v34  ;;  %v988_v47 = vld [vmem:[%s1767_s3 + $0xb8] sm:$0xff]  ;;  %v987_v49 = vld [vmem:[%s1767_s3 + $0xb0] sm:$0xff]  ;;  %v167_v50 = vld [vmem:[%s1767_s3 + $0x28] sm:$0xff] }
  0x1a   :  { %112 = vmatpush.msra.mxu0 %v62_v21  ;;  %v986_v51 = vld [vmem:[%s1767_s3 + $0xa8] sm:$0xff]  ;;  %v55_v52 = vld [vmem:[%s1764_s0 + $0x20] sm:$0xff]  ;;  %v57_v55 = vld [vmem:[%s1764_s0 + $0x30] sm:$0xff] }
  0x1b   :  { %182 = vmatpush.msra.mxu2 %v173_v35  ;;  %228 = vmatpush.msra.mxu3 %v992_v37  ;;  %v166_v53 = vld [vmem:[%s1767_s3 + $0x20] sm:$0xff]  ;;  %v165_v56 = vld [vmem:[%s1767_s3 + $0x18] sm:$0xff]  ;;  %v164_v58 = vld [vmem:[%s1767_s3 + $0x10] sm:$0xff] }
  0x1c   :  { %113 = vmatpush.msra.mxu0 %v61_v22  ;;  %978 = vmatmul.msk.f32.gmra.mxu1 %vm87_vm0, %v54_v23  ;;  %v985_v54 = vld [vmem:[%s1767_s3 + $0xa0] sm:$0xff]  ;;  %v984_v57 = vld [vmem:[%s1767_s3 + $0x98] sm:$0xff]  ;;  %v983_v59 = vld [vmem:[%s1767_s3 + $0x90] sm:$0xff] }
  0x1d   :  { %183 = vmatpush.msra.mxu2 %v172_v38  ;;  %229 = vmatpush.msra.mxu3 %v991_v39  ;;  %v163_v60 = vld [vmem:[%s1767_s3 + $0x8] sm:$0xff]  ;;  %v162_v62 = vld [vmem:[%s1767_s3] sm:$0xff]  ;;  %v999_v34 = vld [vmem:[%s1768_s4 + $0x10] sm:$0xff] }
  0x1e   :  { %114 = vmatpush.msra.mxu0 %v60_v28  ;;  %v982_v61 = vld [vmem:[%s1767_s3 + $0x88] sm:$0xff]  ;;  %v981_v63 = vld [vmem:[%s1767_s3 + $0x80] sm:$0xff]  ;;  %v1010_v37 = vld [vmem:[%s1770_s6 + $0x78] sm:$0xff] }
  0x1f   :  { %184 = vmatpush.msra.mxu2 %v171_v40  ;;  %230 = vmatpush.msra.mxu3 %v990_v41  ;;  %v1091_v1 = vld [vmem:[%s1766_s2] ss:$0 sm:$0xff]  ;;  %v258_v35 = vld [vmem:[%s1768_s4 + $0x8] sm:$0xff]  ;;  %v1009_v38 = vld [vmem:[%s1770_s6 + $0x70] sm:$0xff] }
  0x20   :  { %115 = vmatpush.msra.mxu0 %v59_v31  ;;  %v257_v33 = vld [vmem:[%s1768_s4] sm:$0xff]  ;;  %v1008_v39 = vld [vmem:[%s1770_s6 + $0x68] sm:$0xff]  ;;  %v1006_v41 = vld [vmem:[%s1770_s6 + $0x58] sm:$0xff] }
  0x21   :  { %116 = vmatmul.f32.vlgmr.msra.gmra.mxu0 %v51_v32  ;;  %185 = vmatpush.msra.mxu2 %v170_v43  ;;  %v1007_v40 = vld [vmem:[%s1770_s6 + $0x60] sm:$0xff]  ;;  %v1004_v43 = vld [vmem:[%s1770_s6 + $0x48] sm:$0xff] }
  0x22   :  { %231 = vmatpush.msra.mxu3 %v989_v44  ;;  %v1003_v44 = vld [vmem:[%s1770_s6 + $0x40] sm:$0xff] }
  0x23   :  { %186 = vmatpush.msra.mxu2 %v169_v45  ;;  %v371_v45 = vld [vmem:[%s1770_s6 + $0x38] sm:$0xff] }
  0x24   :  { %979 = vmatmul.msk.f32.gmra.mxu1 %vm87_vm0, %v56_v36  ;;  %232 = vmatpush.msra.mxu3 %v988_v47  ;;  %v1000_v36 = vld [vmem:[%s1768_s4 + $0x18] sm:$0xff]  ;;  %v369_v47 = vld [vmem:[%s1770_s6 + $0x28] sm:$0xff] }
  0x25   :  { %187 = vmatpush.msra.mxu2 %v168_v48  ;;  %v368_v48 = vld [vmem:[%s1770_s6 + $0x20] sm:$0xff] }
  0x26   :  { %233 = vmatpush.msra.mxu3 %v987_v49  ;;  %v367_v49 = vld [vmem:[%s1770_s6 + $0x18] sm:$0xff] }
  0x27   :  { %188 = vmatpush.msra.mxu2 %v167_v50  ;;  %v366_v50 = vld [vmem:[%s1770_s6 + $0x10] sm:$0xff] }
  0x28   :  { %234 = vmatpush.msra.mxu3 %v986_v51 }
  0x29   :  { %119 = vmatmul.f32.gmra.mxu0 %v53_v42  ;;  %189 = vmatpush.msra.mxu2 %v166_v53  ;;  %v1005_v42 = vld [vmem:[%s1770_s6 + $0x50] sm:$0xff]  ;;  %v365_v53 = vld [vmem:[%s1770_s6 + $0x8] sm:$0xff] }
  0x2a   :  { %235 = vmatpush.msra.mxu3 %v985_v54 }
  0x2b   :  { %190 = vmatpush.msra.mxu2 %v165_v56 }
  0x2c   :  { %980 = vmatmul.msk.f32.gmra.mxu1 %vm87_vm0, %v58_v46  ;;  %236 = vmatpush.msra.mxu3 %v984_v57  ;;  %v370_v46 = vld [vmem:[%s1770_s6 + $0x30] sm:$0xff] }
  0x2d   :  { %191 = vmatpush.msra.mxu2 %v164_v58  ;;  %v332_v58 = vld [vmem:[%s1769_s5] sm:$0xff] }
  0x2e   :  { %237 = vmatpush.msra.mxu3 %v983_v59  ;;  %v1017_v59 = vld [vmem:[%s1769_s5 + $0x10] sm:$0xff] }
  0x2f   :  { %192 = vmatpush.msra.mxu2 %v163_v60  ;;  %v1028_v60 = vld [vmem:[%s1770_s6 + $0xb8] sm:$0xff] }
  0x30   :  { %238 = vmatpush.msra.mxu3 %v982_v61  ;;  %v1027_v61 = vld [vmem:[%s1770_s6 + $0xb0] sm:$0xff] }
  0x31   :  { %122 = vmatmul.f32.gmra.mxu0 %v55_v52  ;;  %193 = vmatpush.msra.mxu2 %v162_v62  ;;  %v1026_v62 = vld [vmem:[%s1770_s6 + $0xa8] sm:$0xff] }
  0x32   :  { %239 = vmatpush.msra.mxu3 %v981_v63  ;;  %v333_v63 = vld [vmem:[%s1769_s5 + $0x8] sm:$0xff] }
  0x33   :  { %386 = vmatpush.msrb.mxu2 %v371_v45 }
  0x34   :  { %415 = vmatpush.msrb.mxu3 %v1010_v37  ;;  %v512_v37 = vld [vmem:[%s1772_s8 + $0x10] sm:$0xff] }
  0x35   :  { %387 = vmatpush.msrb.mxu2 %v370_v46 }
  0x36   :  { %416 = vmatpush.msrb.mxu3 %v1009_v38  ;;  %v1033_v38 = vld [vmem:[%s1772_s8 + $0x90] sm:$0xff] }
  0x37   :  { %388 = vmatpush.msrb.mxu2 %v369_v47 }
  0x38   :  { %417 = vmatpush.msrb.mxu3 %v1008_v39  ;;  %v511_v39 = vld [vmem:[%s1772_s8 + $0x8] sm:$0xff] }
  0x39   :  { %125 = vmatmul.f32.gmra.mxu0 %v57_v55  ;;  %389 = vmatpush.msrb.mxu2 %v368_v48 }
  0x3a   :  { %418 = vmatpush.msrb.mxu3 %v1007_v40  ;;  %v1032_v40 = vld [vmem:[%s1772_s8 + $0x88] sm:$0xff] }
  0x3b   :  { %390 = vmatpush.msrb.mxu2 %v367_v49  ;;  %v1092_v49 = vld [vmem:[%s1771_s7] ss:$0 sm:$0xff] }
  0x3c   :  { %419 = vmatpush.msrb.mxu3 %v1006_v41  ;;  %v510_v41 = vld [vmem:[%s1772_s8] sm:$0xff] }
  0x3d   :  { %391 = vmatpush.msrb.mxu2 %v366_v50 }
  0x3e   :  { %420 = vmatpush.msrb.mxu3 %v1005_v42  ;;  %v1031_v42 = vld [vmem:[%s1772_s8 + $0x80] sm:$0xff] }
  0x3f   :  { %392 = vmatpush.msrb.mxu2 %v365_v53 }
  0x40   :  { %421 = vmatpush.msrb.mxu3 %v1004_v43  ;;  %v1060_v43 = vld [vmem:[%s1775_s11 + $0x78] sm:$0xff] }
  0x42   :  { %422 = vmatpush.msrb.mxu3 %v1003_v44  ;;  %v1059_v44 = vld [vmem:[%s1775_s11 + $0x70] sm:$0xff] }
  0x91   :  { %v146_v0 = vpop.f32.mrf.mxu1 }
  0x99   :  { %v149_v5 = vpop.f32.mrf.mxu1 }
  0x9e   :  { %v117_v2 = vpop.f32.mrf.mxu0 }
  0x9f   :  { %v118_v3 = vadd.f32 %v1091_v1, %v117_v2  ;;  %v1025_v2 = vld [vmem:[%s1770_s6 + $0xa0] sm:$0xff] }
  0xa1   :  { %v147_v4 = vadd.f32 %v146_v0, %v118_v3  ;;  %v152_v11 = vpop.f32.mrf.mxu1  ;;  %v1018_v0 = vld [vmem:[%s1769_s5 + $0x18] sm:$0xff] }
  0xa2   :  { %v1024_v3 = vld [vmem:[%s1770_s6 + $0x98] sm:$0xff] }
  0xa3   :  { %v158_v6 = vmax.f32 %v147_v4, 0.0  ;;  %v1023_v4 = vld [vmem:[%s1770_s6 + $0x90] sm:$0xff] }
  0xa5   :  { %194 = vmatmul.f32.vlgmr.msra.gmra.mxu2 %v158_v6  ;;  %240 = vmatmul.f32.vlgmr.msra.gmra.mxu3 %v158_v6  ;;  %v1021_v6 = vld [vmem:[%s1770_s6 + $0x80] sm:$0xff] }
  0xa6   :  { %v120_v7 = vpop.f32.mrf.mxu0 }
  0xa7   :  { %v121_v8 = vadd.f32 %v1091_v1, %v120_v7  ;;  %v525_v7 = vld [vmem:[%s1772_s8 + $0x78] sm:$0xff] }
  0xa9   :  { %v150_v9 = vadd.f32 %v149_v5, %v121_v8  ;;  %v155_v17 = vpop.f32.mrf.mxu1  ;;  %v1022_v5 = vld [vmem:[%s1770_s6 + $0x88] sm:$0xff]  ;;  %v1046_v8 = vld [vmem:[%s1772_s8 + $0xf8] sm:$0xff] }
  0xaa   :  { %566 = vmatpush.msra.mxu3 %v1046_v8  ;;  %v591_v8 = vld [vmem:[%s1773_s9] sm:$0x3] }
  0xab   :  { %v159_v10 = vmax.f32 %v150_v9, 0.0  ;;  %v524_v9 = vld [vmem:[%s1772_s8 + $0x70] sm:$0xff] }
  0xad   :  { %197 = vmatmul.f32.gmra.mxu2 %v159_v10  ;;  %243 = vmatmul.f32.gmra.mxu3 %v159_v10  ;;  %v1045_v10 = vld [vmem:[%s1772_s8 + $0xf0] sm:$0xff] }
  0xae   :  { %v123_v12 = vpop.f32.mrf.mxu0  ;;  %567 = vmatpush.msra.mxu3 %v1045_v10  ;;  %v1049_v10 = vld [vmem:[%s1773_s9 + $0x2] sm:$0x3] }
  0xaf   :  { %v124_v13 = vadd.f32 %v1091_v1, %v123_v12  ;;  %v1044_v12 = vld [vmem:[%s1772_s8 + $0xe8] sm:$0xff] }
  0xb0   :  { %568 = vmatpush.msra.mxu3 %v1044_v12  ;;  %v1063_v12 = vld [vmem:[%s1773_s9 + $0x4] sm:$0x3] }
  0xb1   :  { %v153_v14 = vadd.f32 %v152_v11, %v124_v13  ;;  %v523_v11 = vld [vmem:[%s1772_s8 + $0x68] sm:$0xff]  ;;  %v522_v13 = vld [vmem:[%s1772_s8 + $0x60] sm:$0xff] }
  0xb3   :  { %v160_v15 = vmax.f32 %v153_v14, 0.0  ;;  %v1043_v14 = vld [vmem:[%s1772_s8 + $0xe0] sm:$0xff] }
  0xb4   :  { %569 = vmatpush.msra.mxu3 %v1043_v14  ;;  %v647_v14 = vld [vmem:[%s1775_s11 + $0x38] sm:$0xff] }
  0xb5   :  { %200 = vmatmul.f32.gmra.mxu2 %v160_v15  ;;  %246 = vmatmul.f32.gmra.mxu3 %v160_v15  ;;  %v521_v15 = vld [vmem:[%s1772_s8 + $0x58] sm:$0xff] }
  0xb6   :  { %v126_v16 = vpop.f32.mrf.mxu0 }
  0xb7   :  { %v127_v18 = vadd.f32 %v1091_v1, %v126_v16  ;;  %v364_v1 = vld [vmem:[%s1770_s6] sm:$0xff]  ;;  %v1042_v16 = vld [vmem:[%s1772_s8 + $0xd8] sm:$0xff] }
  0xb8   :  { %393 = vmatpush.msrb.mxu2 %v364_v1  ;;  %570 = vmatpush.msra.mxu3 %v1042_v16  ;;  %v1053_v1 = vld [vmem:[%s1775_s11 + $0x40] sm:$0xff]  ;;  %v645_v16 = vld [vmem:[%s1775_s11 + $0x28] sm:$0xff] }
  0xb9   :  { %v156_v19 = vadd.f32 %v155_v17, %v127_v18  ;;  %v520_v17 = vld [vmem:[%s1772_s8 + $0x50] sm:$0xff] }
  0xba   :  { %526 = vmatpush.msra.mxu2 %v525_v7  ;;  %v1041_v18 = vld [vmem:[%s1772_s8 + $0xd0] sm:$0xff] }
  0xbb   :  { %v161_v20 = vmax.f32 %v156_v19, 0.0  ;;  %v519_v19 = vld [vmem:[%s1772_s8 + $0x48] sm:$0xff]  ;;  %571 = vmatpush.msra.mxu3 %v1041_v18  ;;  %v643_v18 = vld [vmem:[%s1775_s11 + $0x18] sm:$0xff] }
  0xbc   :  { %527 = vmatpush.msra.mxu2 %v524_v9  ;;  %v615_v9 = vld [vmem:[%s1774_s10] sm:$0x3] }
  0xbd   :  { %203 = vmatmul.f32.gmra.mxu2 %v161_v20  ;;  %249 = vmatmul.f32.gmra.mxu3 %v161_v20  ;;  %v1040_v20 = vld [vmem:[%s1772_s8 + $0xc8] sm:$0xff] }
  0xbe   :  { %528 = vmatpush.msra.mxu2 %v523_v11  ;;  %572 = vmatpush.msra.mxu3 %v1040_v20  ;;  %v1051_v11 = vld [vmem:[%s1774_s10 + $0x2] sm:$0x3]  ;;  %v641_v20 = vld [vmem:[%s1775_s11 + $0x8] sm:$0xff] }
  0xc0   :  { %529 = vmatpush.msra.mxu2 %v522_v13  ;;  %v1065_v13 = vld [vmem:[%s1774_s10 + $0x4] sm:$0x3] }
  0xc2   :  { %530 = vmatpush.msra.mxu2 %v521_v15  ;;  %v646_v15 = vld [vmem:[%s1775_s11 + $0x30] sm:$0xff] }
  0xc4   :  { %531 = vmatpush.msra.mxu2 %v520_v17  ;;  %v644_v17 = vld [vmem:[%s1775_s11 + $0x20] sm:$0xff] }
  0xc6   :  { %532 = vmatpush.msra.mxu2 %v519_v19  ;;  %v642_v19 = vld [vmem:[%s1775_s11 + $0x10] sm:$0xff] }
 0x128   :  { %v195_v21 = vpop.f32.mrf.mxu2  ;;  %v241_v22 = vpop.f32.mrf.mxu3 }
 0x129   :  { %v253_v32 = vmax.f32 %v195_v21, %v241_v22  ;;  %v518_v21 = vld [vmem:[%s1772_s8 + $0x40] sm:$0xff] }
 0x12a   :  { %v1039_v22 = vld [vmem:[%s1772_s8 + $0xc0] sm:$0xff]  ;;  %533 = vmatpush.msra.mxu2 %v518_v21 }
 0x12b   :  { %573 = vmatpush.msra.mxu3 %v1039_v22  ;;  %v640_v21 = vld [vmem:[%s1775_s11] sm:$0xff]  ;;  %v1074_v22 = vld [vmem:[%s1775_s11 + $0xb8] sm:$0xff] }
 0x130   :  { %v198_v23 = vpop.f32.mrf.mxu2  ;;  %v244_v24 = vpop.f32.mrf.mxu3 }
 0x131   :  { %v254_v31 = vmax.f32 %v198_v23, %v244_v24  ;;  %v517_v23 = vld [vmem:[%s1772_s8 + $0x38] sm:$0xff] }
 0x132   :  { %v1038_v24 = vld [vmem:[%s1772_s8 + $0xb8] sm:$0xff]  ;;  %534 = vmatpush.msra.mxu2 %v517_v23  ;;  %v1073_v23 = vld [vmem:[%s1775_s11 + $0xb0] sm:$0xff] }
 0x133   :  { %574 = vmatpush.msra.mxu3 %v1038_v24  ;;  %v1072_v24 = vld [vmem:[%s1775_s11 + $0xa8] sm:$0xff] }
 0x138   :  { %v201_v25 = vpop.f32.mrf.mxu2  ;;  %v247_v26 = vpop.f32.mrf.mxu3 }
 0x139   :  { %v255_v30 = vmax.f32 %v201_v25, %v247_v26  ;;  %v516_v25 = vld [vmem:[%s1772_s8 + $0x30] sm:$0xff] }
 0x13a   :  { %v1037_v26 = vld [vmem:[%s1772_s8 + $0xb0] sm:$0xff]  ;;  %535 = vmatpush.msra.mxu2 %v516_v25  ;;  %v1071_v25 = vld [vmem:[%s1775_s11 + $0xa0] sm:$0xff] }
 0x13b   :  { %575 = vmatpush.msra.mxu3 %v1037_v26  ;;  %v1070_v26 = vld [vmem:[%s1775_s11 + $0x98] sm:$0xff] }
 0x140   :  { %v204_v27 = vpop.f32.mrf.mxu2  ;;  %v250_v28 = vpop.f32.mrf.mxu3 }
 0x141   :  { %v256_v29 = vmax.f32 %v204_v27, %v250_v28  ;;  %v515_v27 = vld [vmem:[%s1772_s8 + $0x28] sm:$0xff] }
 0x142   :  { %v1036_v28 = vld [vmem:[%s1772_s8 + $0xa8] sm:$0xff]  ;;  %536 = vmatpush.msra.mxu2 %v515_v27  ;;  %v1069_v27 = vld [vmem:[%s1775_s11 + $0x90] sm:$0xff] }
 0x143   :  { %278 = vmatpush.msrb.mxu1 %v256_v29  ;;  %310 = vmatpush.msrb.mxu0 %v256_v29 }
 0x144   :  { %576 = vmatpush.msra.mxu3 %v1036_v28  ;;  %v1068_v28 = vld [vmem:[%s1775_s11 + $0x88] sm:$0xff] }
 0x145   :  { %279 = vmatpush.msrb.mxu1 %v255_v30  ;;  %311 = vmatpush.msrb.mxu0 %v255_v30 }
 0x147   :  { %280 = vmatpush.msrb.mxu1 %v254_v31  ;;  %312 = vmatpush.msrb.mxu0 %v254_v31 }
 0x149   :  { %281 = vmatpush.msrb.mxu1 %v253_v32  ;;  %313 = vmatpush.msrb.mxu0 %v253_v32 }
 0x14a   :  { %997 = vmatmul.msk.f32.vlgmr.msrb.gmra.mxu1 %vm259_vm1, %v257_v33  ;;  %1001 = vmatmul.msk.f32.vlgmr.msrb.gmra.mxu0 %vm259_vm1, %v999_v34  ;;  %v514_v33 = vld [vmem:[%s1772_s8 + $0x20] sm:$0xff] }
 0x14b   :  { %v1035_v34 = vld [vmem:[%s1772_s8 + $0xa0] sm:$0xff]  ;;  %537 = vmatpush.msra.mxu2 %v514_v33 }
 0x14c   :  { %577 = vmatpush.msra.mxu3 %v1035_v34 }
 0x152   :  { %998 = vmatmul.msk.f32.gmra.mxu1 %vm259_vm1, %v258_v35  ;;  %1002 = vmatmul.msk.f32.gmra.mxu0 %vm259_vm1, %v1000_v36  ;;  %v513_v35 = vld [vmem:[%s1772_s8 + $0x18] sm:$0xff] }
 0x153   :  { %v1034_v36 = vld [vmem:[%s1772_s8 + $0x98] sm:$0xff]  ;;  %538 = vmatpush.msra.mxu2 %v513_v35 }
 0x154   :  { %578 = vmatpush.msra.mxu3 %v1034_v36 }
 0x155   :  { %539 = vmatpush.msra.mxu2 %v512_v37 }
 0x156   :  { %579 = vmatpush.msra.mxu3 %v1033_v38 }
 0x157   :  { %540 = vmatpush.msra.mxu2 %v511_v39 }
 0x158   :  { %580 = vmatpush.msra.mxu3 %v1032_v40  ;;  %v1078_v40 = vld [vmem:[%s1774_s10 + $0x6] sm:$0x3] }
 0x159   :  { %541 = vmatpush.msra.mxu2 %v510_v41 }
 0x15a   :  { %581 = vmatpush.msra.mxu3 %v1031_v42 }
 0x1c7   :  { %v283_v51 = vpop.f32.mrf.mxu1  ;;  %v315_v52 = vpop.f32.mrf.mxu0 }
 0x1c8   :  { %v321_v54 = vmax.f32 %v283_v51, %v315_v52 }
 0x1ca   :  { %1015 = vmatmul.msk.f32.vlgmr.msrb.gmra.mxu3 %vm87_vm0, %v321_v54 }
 0x1cb   :  { %742 = vmatpush.msrb.mxu3 %v647_v14 }
 0x1cd   :  { %743 = vmatpush.msrb.mxu3 %v646_v15 }
 0x1cf   :  { %v286_v55 = vpop.f32.mrf.mxu1  ;;  %v318_v56 = vpop.f32.mrf.mxu0  ;;  %744 = vmatpush.msrb.mxu3 %v645_v16 }
 0x1d0   :  { %v322_v57 = vmax.f32 %v286_v55, %v318_v56 }
 0x1d1   :  { %745 = vmatpush.msrb.mxu3 %v644_v17 }
 0x1d2   :  { %355 = vmatpush.msra.mxu1 %v322_v57  ;;  %453 = vmatpush.msra.mxu0 %v322_v57 }
 0x1d3   :  { %1016 = vmatmul.msk.f32.gmra.mxu3 %vm87_vm0, %v322_v57 }
 0x1d4   :  { %356 = vmatpush.msra.mxu1 %v321_v54  ;;  %454 = vmatpush.msra.mxu0 %v321_v54 }
 0x1d5   :  { %1011 = vmatmul.msk.f32.vlgmr.msra.gmra.mxu1 %vm334_vm2, %v332_v58  ;;  %1019 = vmatmul.msk.f32.vlgmr.msra.gmra.mxu0 %vm334_vm2, %v1017_v59 }
 0x1d6   :  { %485 = vmatpush.msrb.mxu1 %v1028_v60  ;;  %v1058_v60 = vld [vmem:[%s1775_s11 + $0x68] sm:$0xff]  ;;  %746 = vmatpush.msrb.mxu3 %v643_v18 }
 0x1d8   :  { %486 = vmatpush.msrb.mxu1 %v1027_v61  ;;  %v1057_v61 = vld [vmem:[%s1775_s11 + $0x60] sm:$0xff]  ;;  %747 = vmatpush.msrb.mxu3 %v642_v19 }
 0x1da   :  { %487 = vmatpush.msrb.mxu1 %v1026_v62  ;;  %v1056_v62 = vld [vmem:[%s1775_s11 + $0x58] sm:$0xff]  ;;  %748 = vmatpush.msrb.mxu3 %v641_v20 }
 0x1dc   :  { %488 = vmatpush.msrb.mxu1 %v1025_v2  ;;  %749 = vmatpush.msrb.mxu3 %v640_v21 }
 0x1dd   :  { %1012 = vmatmul.msk.f32.gmra.mxu1 %vm334_vm2, %v333_v63  ;;  %1020 = vmatmul.msk.f32.gmra.mxu0 %vm334_vm2, %v1018_v0  ;;  %v1055_v63 = vld [vmem:[%s1775_s11 + $0x50] sm:$0xff]  ;;  %v1054_v0 = vld [vmem:[%s1775_s11 + $0x48] sm:$0xff] }
 0x1de   :  { %489 = vmatpush.msrb.mxu1 %v1024_v3 }
 0x1e0   :  { %490 = vmatpush.msrb.mxu1 %v1023_v4 }
 0x1e2   :  { %491 = vmatpush.msrb.mxu1 %v1022_v5 }
 0x1e4   :  { %492 = vmatpush.msrb.mxu1 %v1021_v6 }
 0x24d   :  { %v424_v45 = vpop.f32.mrf.mxu3 }
 0x252   :  { %v358_v29 = vpop.f32.mrf.mxu1  ;;  %v456_v30 = vpop.f32.mrf.mxu0 }
 0x253   :  { %1013 = vmatmul.msk.f32.vlgmr.msrb.gmra.mxu2 %vm87_vm0, %v358_v29  ;;  %1029 = vmatmul.msk.f32.vlgmr.msrb.gmra.mxu1 %vm87_vm0, %v456_v30  ;;  %v1067_v29 = vld [vmem:[%s1775_s11 + $0x80] sm:$0xff] }
 0x254   :  { %719 = vmatpush.msrb.mxu2 %v1060_v43  ;;  %v1076_v30 = vld [vmem:[%s1773_s9 + $0x6] sm:$0x3]  ;;  %v1085_v43 = vld [vmem:[%s1775_s11 + $0xe8] sm:$0xff] }
 0x256   :  { %720 = vmatpush.msrb.mxu2 %v1059_v44  ;;  %v427_v52 = vpop.f32.mrf.mxu3  ;;  %v1084_v44 = vld [vmem:[%s1775_s11 + $0xe0] sm:$0xff] }
 0x258   :  { %721 = vmatpush.msrb.mxu2 %v1058_v60 }
 0x25a   :  { %v361_v31 = vpop.f32.mrf.mxu1  ;;  %v459_v32 = vpop.f32.mrf.mxu0  ;;  %722 = vmatpush.msrb.mxu2 %v1057_v61  ;;  %v1093_v61 = vld [vmem:[%s1776_s12] ss:$0 sm:$0xff] }
 0x25b   :  { %1014 = vmatmul.msk.f32.gmra.mxu2 %vm87_vm0, %v361_v31  ;;  %1030 = vmatmul.msk.f32.gmra.mxu1 %vm87_vm0, %v459_v32  ;;  %v1087_v31 = vld [vmem:[%s1775_s11 + $0xf8] sm:$0xff]  ;;  %v1086_v32 = vld [vmem:[%s1775_s11 + $0xf0] sm:$0xff] }
 0x25c   :  { %723 = vmatpush.msrb.mxu2 %v1056_v62 }
 0x25e   :  { %724 = vmatpush.msrb.mxu2 %v1055_v63 }
 0x260   :  { %725 = vmatpush.msrb.mxu2 %v1054_v0 }
 0x262   :  { %726 = vmatpush.msrb.mxu2 %v1053_v1 }
 0x2d0   :  { %v494_v46 = vpop.f32.mrf.mxu1 }
 0x2d6   :  { %v395_v47 = vpop.f32.mrf.mxu2 }
 0x2d7   :  { %v425_v48 = vadd.f32 %v424_v45, %v395_v47  ;;  %v1083_v45 = vld [vmem:[%s1775_s11 + $0xd8] sm:$0xff]  ;;  %v1081_v47 = vld [vmem:[%s1775_s11 + $0xc8] sm:$0xff] }
 0x2d8   :  { %v497_v55 = vpop.f32.mrf.mxu1 }
 0x2d9   :  { %v500_v50 = vadd.f32 %v494_v46, %v425_v48  ;;  %v1082_v46 = vld [vmem:[%s1775_s11 + $0xd0] sm:$0xff]  ;;  %v1080_v48 = vld [vmem:[%s1775_s11 + $0xc0] sm:$0xff] }
 0x2db   :  { %v506_v51 = vadd.f32 %v1092_v49, %v500_v50 }
 0x2dd   :  { %v508_v53 = vmax.f32 %v506_v51, 0.0 }
 0x2de   :  { %v398_v54 = vpop.f32.mrf.mxu2 }
 0x2df   :  { %v428_v56 = vadd.f32 %v427_v52, %v398_v54  ;;  %542 = vmatmul.f32.vlgmr.msra.gmra.mxu2 %v508_v53  ;;  %582 = vmatmul.f32.vlgmr.msra.gmra.mxu3 %v508_v53  ;;  %v931_v53 = vld [vmem:[%s1777_s13 + $0x18] sm:$0xff]  ;;  %v930_v54 = vld [vmem:[%s1777_s13 + $0x10] sm:$0xff] }
 0x2e0   :  { %909 = vmatpush.msra.mxu3 %v1087_v31 }
 0x2e1   :  { %v501_v57 = vadd.f32 %v497_v55, %v428_v56  ;;  %v929_v55 = vld [vmem:[%s1777_s13 + $0x8] sm:$0xff]  ;;  %v928_v56 = vld [vmem:[%s1777_s13] sm:$0xff]  ;;  %s1121_s13 = smov [#allocation2]  }
 0x2e2   :  { %910 = vmatpush.msra.mxu3 %v1086_v32  ;;  %s966_s20 = sshll.u32 %s1121_s13, 4  ;;  %s967_s20 = int_to_ptr.vmem [resolvable:$true] %s966_s20 }
 0x2e3   :  { %v507_v58 = vadd.f32 %v1092_v49, %v501_v57 }
 0x2e4   :  { %911 = vmatpush.msra.mxu3 %v1085_v43 }
 0x2e5   :  { %v509_v59 = vmax.f32 %v507_v58, 0.0 }
 0x2e6   :  { %912 = vmatpush.msra.mxu3 %v1084_v44 }
 0x2e7   :  { %545 = vmatmul.f32.gmra.mxu2 %v509_v59  ;;  %585 = vmatmul.f32.gmra.mxu3 %v509_v59 }
 0x2e8   :  { %913 = vmatpush.msra.mxu3 %v1083_v45 }
 0x2ea   :  { %914 = vmatpush.msra.mxu3 %v1082_v46 }
 0x2ec   :  { %915 = vmatpush.msra.mxu3 %v1081_v47 }
 0x2ee   :  { %916 = vmatpush.msra.mxu3 %v1080_v48 }
 0x362   :  { %v543_v2 = vpop.f32.mrf.mxu2  ;;  %v583_v3 = vpop.f32.mrf.mxu3 }
 0x363   :  { %v589_v7 = vmax.f32 %v543_v2, %v583_v3  ;;  %v1094_v2 = vld [vmem:[%s1778_s14] ss:$0 sm:$0xff] }
 0x36a   :  { %v546_v4 = vpop.f32.mrf.mxu2  ;;  %v586_v5 = vpop.f32.mrf.mxu3 }
 0x36b   :  { %v590_v6 = vmax.f32 %v546_v4, %v586_v5 }
 0x36d   :  { %609 = vmatpush.msrb.mxu0 %v590_v6  ;;  %633 = vmatpush.msra.mxu1 %v590_v6 }
 0x36e   :  { %882 = vmatpush.msra.mxu2 %v590_v6 }
 0x36f   :  { %610 = vmatpush.msrb.mxu0 %v589_v7  ;;  %634 = vmatpush.msra.mxu1 %v589_v7 }
 0x370   :  { %883 = vmatpush.msra.mxu2 %v589_v7  ;;  %1047 = vmatmul.msk.f32.vlgmr.msrb.gmra.mxu0 %vm334_vm2, %v591_v8 }
 0x371   :  { %1048 = vmatmul.msk.f32.vlgmr.msra.gmra.mxu1 %vm334_vm2, %v615_v9  ;;  %667 = vmatpush.msra.mxu0 %v590_v6 }
 0x372   :  { %692 = vmatpush.msrb.mxu1 %v590_v6 }
 0x373   :  { %668 = vmatpush.msra.mxu0 %v589_v7 }
 0x374   :  { %693 = vmatpush.msrb.mxu1 %v589_v7 }
 0x375   :  { %773 = vmatpush.msrb.mxu0 %v590_v6 }
 0x376   :  { %798 = vmatpush.msra.mxu1 %v590_v6 }
 0x377   :  { %774 = vmatpush.msrb.mxu0 %v589_v7 }
 0x378   :  { %799 = vmatpush.msra.mxu1 %v589_v7  ;;  %1050 = vmatmul.msk.f32.vlgmr.msra.gmra.mxu0 %vm334_vm2, %v1049_v10 }
 0x379   :  { %1052 = vmatmul.msk.f32.vlgmr.msrb.gmra.mxu1 %vm334_vm2, %v1051_v11  ;;  %825 = vmatpush.msra.mxu0 %v1074_v22 }
 0x37a   :  { %857 = vmatpush.msrb.mxu1 %v590_v6 }
 0x37b   :  { %826 = vmatpush.msra.mxu0 %v1073_v23 }
 0x37c   :  { %858 = vmatpush.msrb.mxu1 %v589_v7 }
 0x37d   :  { %827 = vmatpush.msra.mxu0 %v1072_v24 }
 0x37f   :  { %828 = vmatpush.msra.mxu0 %v1071_v25 }
 0x380   :  { %1064 = vmatmul.msk.f32.vlgmr.msrb.gmra.mxu0 %vm334_vm2, %v1063_v12 }
 0x381   :  { %1066 = vmatmul.msk.f32.vlgmr.msra.gmra.mxu1 %vm334_vm2, %v1065_v13  ;;  %829 = vmatpush.msra.mxu0 %v1070_v26 }
 0x382   :  { %951 = vmatpush.msra.mxu1 %v931_v53 }
 0x383   :  { %830 = vmatpush.msra.mxu0 %v1069_v27 }
 0x384   :  { %952 = vmatpush.msra.mxu1 %v930_v54 }
 0x385   :  { %831 = vmatpush.msra.mxu0 %v1068_v28 }
 0x386   :  { %953 = vmatpush.msra.mxu1 %v929_v55 }
 0x387   :  { %832 = vmatpush.msra.mxu0 %v1067_v29 }
 0x388   :  { %954 = vmatpush.msra.mxu1 %v928_v56 }
 0x389   :  { %1077 = vmatmul.msk.f32.vlgmr.msrb.gmra.mxu1 %vm334_vm2, %v1076_v30 }
 0x3ed   :  { %v612_v33 = vpop.f32.mrf.mxu0 }
 0x3ee   :  { %v636_v34 = vpop.f32.mrf.mxu1 }
 0x3ef   :  { %v639_v35 = vmax.f32 %v612_v33, %v636_v34 }
 0x3f1   :  { %1062 = vmatmul.msk.f32.vlgmr.msrb.gmra.mxu3 %vm87_vm0, %v639_v35 }
 0x3f5   :  { %v670_v36 = vpop.f32.mrf.mxu0 }
 0x3f6   :  { %v695_v37 = vpop.f32.mrf.mxu1 }
 0x3f7   :  { %v698_v38 = vmax.f32 %v670_v36, %v695_v37 }
 0x3f9   :  { %1061 = vmatmul.msk.f32.vlgmr.msrb.gmra.mxu2 %vm87_vm0, %v698_v38 }
 0x3fd   :  { %v776_v39 = vpop.f32.mrf.mxu0 }
 0x3fe   :  { %v801_v41 = vpop.f32.mrf.mxu1 }
 0x3ff   :  { %v804_v42 = vmax.f32 %v776_v39, %v801_v41 }
 0x401   :  { %1079 = vmatmul.msk.f32.vlgmr.msra.gmra.mxu2 %vm334_vm2, %v1078_v40  ;;  %1075 = vmatmul.msk.f32.vlgmr.msra.gmra.mxu0 %vm87_vm0, %v804_v42 }
 0x406   :  { %v860_v50 = vpop.f32.mrf.mxu1 }
 0x474   :  { %v751_v57 = vpop.f32.mrf.mxu3 }
 0x47c   :  { %v728_v49 = vpop.f32.mrf.mxu2 }
 0x47d   :  { %v752_v58 = vadd.f32 %v751_v57, %v728_v49 }
 0x47e   :  { %v834_v59 = vpop.f32.mrf.mxu0 }
 0x47f   :  { %v837_v60 = vadd.f32 %v834_v59, %v752_v58 }
 0x484   :  { %v885_v51 = vpop.f32.mrf.mxu2 }
 0x485   :  { %v888_v52 = vmax.f32 %v860_v50, %v885_v51 }
 0x487   :  { %1088 = vmatmul.msk.f32.vlgmr.msra.gmra.mxu3 %vm87_vm0, %v888_v52 }
 0x50a   :  { %v918_v62 = vpop.f32.mrf.mxu3 }
 0x50b   :  { %v921_v63 = vadd.f32 %v918_v62, %v837_v60 }
 0x50d   :  { %v926_v0 = vadd.f32 %v1093_v61, %v921_v63 }
 0x50f   :  { %v927_v1 = vmax.f32 %v926_v0, 0.0 }
 0x511   :  { %1089 = vmatmul.msk.f32.vlgmr.msra.gmra.mxu1 %vm259_vm1, %v927_v1 }
 0x58e   :  { %v956_v3 = vpop.f32.mrf.mxu1 }
 0x58f   :  { %v957_v4 = vadd.f32 %v1094_v2, %v956_v3 }
 0x591   :  { %960 = vst.msk [vmem:[#allocation2] sm:$0x3] %vm959_vm3, %v957_v4 }
 0x592   :  { %971 = dma.vmem_to_hbm [thread:$0]  %s967_s20, 32, %s969_s21, [#allocation3]  }
 0x593   :  { %1119 = dma.done.wait [#allocation3], 32  }
 0x594   :  { %1120 = vsyncadd [#allocation3], 4294967264 }
 0x595   :  { %976 = vsyncpa [#allocation3], 1 }

</bundles_post_ra>
